<compile_context>
chip_gen: v5e
topology: v5e:2x2
jax: 0.10.0
libtpu: 0.0.40
codegen_flags: <defaults>
</compile_context>

<pallas_src>
import math
from functools import partial

import jax
import jax.numpy as jnp
from jax.experimental import pallas as pl
from jax.experimental.pallas import tpu as pltpu

_INV_SQRT2 = 1.0 / math.sqrt(2.0)

# Universal tile plan ("all" target from the review): 512x512 output tiles and
# K chunks up to 1024 => ~256 flops/byte, near/above the v5e & v7x ridge and a
# big step up on v6e, while the live VMEM (~14 MiB with bf16 outputs) fits
# every generation (v7x has only 64 MiB physical).  v6e could go to 1024-class
# tiles; kept at 512 so a single plan is safe everywhere.
_TM_CAP = 512
_TN_CAP = 512
_TK_CAP = 1024
_VMEM_LIMIT_BYTES = 48 * 1024 * 1024   # > per-gen defaults, < every physical size


def _round_up(x, m):
    return ((x + m - 1) // m) * m


def _largest_divisor_tile(dim, cap):
    """Largest multiple of 128 that divides `dim` (a 128-multiple) and is <= cap."""
    best = 128
    t = 128
    while t <= min(dim, cap):
        if dim % t == 0:
            best = t
        t += 128
    return best


def _erf(x):
    # Abramowitz & Stegun 7.1.26 (|abs error| <= 1.5e-7) -- uses only
    # exp / mul / add / abs / select, all natively lowered by Mosaic.
    p = 0.3275911
    a1, a2, a3, a4, a5 = (0.254829592, -0.284496736, 1.421413741,
                          -1.453152027, 1.061405429)
    sign = jnp.where(x >= 0.0, 1.0, -1.0)
    ax = jnp.abs(x)
    t = 1.0 / (1.0 + p * ax)
    poly = ((((a5 * t + a4) * t + a3) * t + a2) * t + a1) * t
    return sign * (1.0 - poly * jnp.exp(-ax * ax))


def _gelu(y):
    # Exact (erf-based) GELU, matching torch.nn.GELU() (approximate='none'),
    # to within 1.5e-7 of the true erf.
    return 0.5 * y * (1.0 + _erf(y * _INV_SQRT2))


def _ff_dual_kernel(xp_ref, xh_ref, w_ref, b_ref, op_ref, oh_ref,
                    accp_ref, acch_ref):
    """One (tm, tn) tile of GELU(x @ W_kn + b) for BOTH inputs per grid step.

    The weight tile is fetched once and reused by two MXU matmuls.  x tiles
    arrive as f32 and are cast to bf16 in-register (no wrapper cast pass).
    """
    k = pl.program_id(2)

    w = w_ref[...]                                            # (tk, tn) bf16
    pp = jnp.dot(xp_ref[...].astype(jnp.bfloat16), w,
                 preferred_element_type=jnp.float32)          # (tm, tn) f32
    ph = jnp.dot(xh_ref[...].astype(jnp.bfloat16), w,
                 preferred_element_type=jnp.float32)

    @pl.when(k == 0)                 # first K chunk: write, don't zero-then-add
    def _():
        accp_ref[...] = pp
        acch_ref[...] = ph

    @pl.when(k > 0)
    def _():
        accp_ref[...] += pp
        acch_ref[...] += ph

    @pl.when(k == pl.num_programs(2) - 1)
    def _():
        b = b_ref[...]                                        # (1, tn) f32
        op_ref[...] = _gelu(accp_ref[...] + b).astype(op_ref.dtype)
        oh_ref[...] = _gelu(acch_ref[...] + b).astype(oh_ref.dtype)


def _ff_matmul_gelu_dual(xp, xh, w_kn, b2, out_dtype):
    """(GELU(xp @ W_kn + b), GELU(xh @ W_kn + b)) with one tiled pallas_call.

    xp, xh: (M, K_pad) float32      (K padded to 128-multiple if needed)
    w_kn:   (K_pad, N_pad) bfloat16 (pre-transposed, pre-padded, done once)
    b2:     (1, N_pad) float32
    """
    M, K = xp.shape
    Kw, N = w_kn.shape
    assert K == Kw and xh.shape == (M, K)

    tm = M if M <= _TM_CAP else _TM_CAP          # partial last M block is fine
    tn = _largest_divisor_tile(N, _TN_CAP)
    tk = _largest_divisor_tile(K, _TK_CAP)
    grid = (pl.cdiv(M, tm), N // tn, K // tk)

    out_bytes = jnp.dtype(out_dtype).itemsize
    cost = pl.CostEstimate(
        flops=2 * 2 * M * N * K,                 # two matmuls
        transcendentals=2 * M * N,               # one exp per output element
        bytes_accessed=(2 * M * K * 4 * grid[1]      # both x, re-read per N tile
                        + K * N * 2 * grid[0]        # weight, re-read per M tile
                        + N * 4                      # bias
                        + 2 * M * N * out_bytes))    # outputs

    return pl.pallas_call(
        _ff_dual_kernel,
        out_shape=(jax.ShapeDtypeStruct((M, N), out_dtype),
                   jax.ShapeDtypeStruct((M, N), out_dtype)),
        grid_spec=pltpu.PrefetchScalarGridSpec(
            num_scalar_prefetch=0,
            grid=grid,
            in_specs=[
                pl.BlockSpec((tm, tk), lambda i, j, k: (i, k)),   # x_p (f32)
                pl.BlockSpec((tm, tk), lambda i, j, k: (i, k)),   # x_h (f32)
                pl.BlockSpec((tk, tn), lambda i, j, k: (k, j)),   # W (K, N) bf16
                pl.BlockSpec((1, tn), lambda i, j, k: (0, j)),    # bias (f32)
            ],
            out_specs=(
                pl.BlockSpec((tm, tn), lambda i, j, k: (i, j)),
                pl.BlockSpec((tm, tn), lambda i, j, k: (i, j)),
            ),
            scratch_shapes=[pltpu.VMEM((tm, tn), jnp.float32),
                            pltpu.VMEM((tm, tn), jnp.float32)],
        ),
        compiler_params=pltpu.CompilerParams(
            dimension_semantics=("parallel", "parallel", "arbitrary"),
            vmem_limit_bytes=_VMEM_LIMIT_BYTES),
        cost_estimate=cost,
    )(xp, xh, w_kn, b2)


def prepare_ff_params(weight, bias):
    """One-time parameter preparation (hoisted out of the forward hot path).

    * transpose torch (out, in) -> (in=K, out=N) so the kernel does a plain
      K-major contraction (no per-tile transpose),
    * cast to bf16 (MXU operand dtype),
    * zero-pad both dims to a multiple of 128 (lane-dense tiles).
    """
    H = weight.shape[0]
    H_pad = _round_up(H, 128)
    w_kn = jnp.zeros((H_pad, H_pad), jnp.bfloat16).at[:H, :H].set(
        jnp.asarray(weight).T.astype(jnp.bfloat16))
    b2 = jnp.zeros((1, H_pad), jnp.float32).at[0, :H].set(
        jnp.asarray(bias, jnp.float32))
    return w_kn, b2


@partial(jax.jit, static_argnames=("out_dtype",))
def ff_layer_forward(out_p, out_h, w_kn, b2, out_dtype=jnp.bfloat16):
    """FFLayer.forward: (gelu(linear(out_p)), gelu(linear(out_h))).

    Both applications run inside a single pallas_call (two in/out specs), so
    each weight tile read from HBM feeds two matmuls.  No concatenate and no
    wrapper bf16 cast of the activations.  Pass out_dtype=jnp.float32 if f32
    outputs are required.
    """
    H = out_p.shape[-1]
    H_pad = w_kn.shape[1]

    xp = out_p.reshape(-1, H)
    xh = out_h.reshape(-1, H)
    if H_pad != H:                       # only when hidden is not a 128-multiple
        xp = jnp.pad(xp, ((0, 0), (0, H_pad - H)))
        xh = jnp.pad(xh, ((0, 0), (0, H_pad - H)))

    mp, mh = xp.shape[0], xh.shape[0]
    m = max(mp, mh)
    if mp != m:                          # rare: different premise/hyp lengths
        xp = jnp.pad(xp, ((0, m - mp), (0, 0)))
    if mh != m:
        xh = jnp.pad(xh, ((0, m - mh), (0, 0)))

    yp, yh = _ff_matmul_gelu_dual(xp, xh, w_kn, b2, out_dtype)

    if H_pad != H or m != mp:
        yp = yp[:mp, :H]
    if H_pad != H or m != mh:
        yh = yh[:mh, :H]
    return yp.reshape(out_p.shape), yh.reshape(out_h.shape)


if __name__ == "__main__":
    # Small shapes consistent with the module: batch=2, seq=8, hidden=32.
    batch, seq, hidden = 2, 8, 32
    key = jax.random.PRNGKey(0)
    k_p, k_h, k_w, k_b = jax.random.split(key, 4)

    out_p = jax.random.normal(k_p, (batch, seq, hidden), dtype=jnp.float32)
    out_h = jax.random.normal(k_h, (batch, seq, hidden), dtype=jnp.float32)

    # Parameter init mimicking nn.Linear's uniform(-1/sqrt(H), 1/sqrt(H)).
    bound = 1.0 / math.sqrt(hidden)
    weight = jax.random.uniform(k_w, (hidden, hidden), jnp.float32, -bound, bound)
    bias = jax.random.uniform(k_b, (hidden,), jnp.float32, -bound, bound)

    # One-time weight/bias preparation (NOT in the per-call hot path).
    w_kn, b2 = prepare_ff_params(weight, bias)

    y_p, y_h = ff_layer_forward(out_p, out_h, w_kn, b2)
    jax.block_until_ready((y_p, y_h))
    assert y_p.shape == out_p.shape and y_h.shape == out_h.shape

    # Reference: plain f32 JAX, same math as torch Linear + nn.GELU().
    def ref(x):
        y = x @ weight.T + bias
        return 0.5 * y * (1.0 + jax.lax.erf(y / math.sqrt(2.0)))

    # bf16 MXU operands + bf16 output -> ~1e-2 absolute vs the f32 reference.
    for got, want in ((y_p, ref(out_p)), (y_h, ref(out_h))):
        g = got.astype(jnp.float32)
        assert jnp.allclose(g, want, atol=4e-2, rtol=4e-2), \
            float(jnp.max(jnp.abs(g - want)))

    print("KERNEL_OK")
</pallas_src>

<mosaic_0001>
module attributes {stable_mosaic.version = 11 : i64} {
  func.func @_ff_dual_kernel(%arg0: i32, %arg1: i32, %arg2: i32, %arg3: memref<16x128xf32, #tpu.memory_space<vmem>>, %arg4: memref<16x128xf32, #tpu.memory_space<vmem>>, %arg5: memref<128x128xbf16, #tpu.memory_space<vmem>>, %arg6: memref<1x128xf32, #tpu.memory_space<vmem>>, %arg7: memref<16x128xbf16, #tpu.memory_space<vmem>>, %arg8: memref<16x128xbf16, #tpu.memory_space<vmem>>, %arg9: memref<16x128xf32, #tpu.memory_space<vmem>>, %arg10: memref<16x128xf32, #tpu.memory_space<vmem>>) attributes {dimension_semantics = [#tpu.dimension_semantics<parallel>, #tpu.dimension_semantics<parallel>, #tpu.dimension_semantics<arbitrary>], iteration_bounds = array<i64: 1, 1, 1>, scalar_prefetch = 0 : i64, scratch_operands = 2 : i64, tpu.core_type = #tpu.core_type<tc>, window_params = [{transform_indices = @transform_0, window_bounds = array<i64: 16, 128>}, {transform_indices = @transform_1, window_bounds = array<i64: 16, 128>}, {transform_indices = @transform_2, window_bounds = array<i64: 128, 128>}, {transform_indices = @transform_3, window_bounds = array<i64: 1, 128>}, {transform_indices = @transform_4, window_bounds = array<i64: 16, 128>}, {transform_indices = @transform_5, window_bounds = array<i64: 16, 128>}]} {
    %c0 = arith.constant 0 : index
    %c0_0 = arith.constant 0 : index
    %0 = vector.load %arg5[%c0, %c0_0] : memref<128x128xbf16, #tpu.memory_space<vmem>>, vector<128x128xbf16>
    %c0_1 = arith.constant 0 : index
    %c0_2 = arith.constant 0 : index
    %1 = vector.load %arg3[%c0_1, %c0_2] : memref<16x128xf32, #tpu.memory_space<vmem>>, vector<16x128xf32>
    %2 = arith.truncf %1 : vector<16x128xf32> to vector<16x128xbf16>
    %cst = arith.constant dense<0.000000e+00> : vector<16x128xf32>
    %3 = tpu.matmul %2, %0, %cst {dimension_numbers = #tpu.dot_dimension_numbers<[1], [0], [0], [1], [0, 0, 1, 1], [], []>} : vector<16x128xbf16>, vector<128x128xbf16>, vector<16x128xf32> -> vector<16x128xf32>
    %c0_3 = arith.constant 0 : index
    %c0_4 = arith.constant 0 : index
    %4 = vector.load %arg4[%c0_3, %c0_4] : memref<16x128xf32, #tpu.memory_space<vmem>>, vector<16x128xf32>
    %5 = arith.truncf %4 : vector<16x128xf32> to vector<16x128xbf16>
    %cst_5 = arith.constant dense<0.000000e+00> : vector<16x128xf32>
    %6 = tpu.matmul %5, %0, %cst_5 {dimension_numbers = #tpu.dot_dimension_numbers<[1], [0], [0], [1], [0, 0, 1, 1], [], []>} : vector<16x128xbf16>, vector<128x128xbf16>, vector<16x128xf32> -> vector<16x128xf32>
    %c0_i32 = arith.constant 0 : i32
    %7 = arith.cmpi eq, %arg2, %c0_i32 : i32
    %8 = arith.extui %7 : i1 to i32
    %c0_i32_6 = arith.constant 0 : i32
    %9 = arith.cmpi ne, %8, %c0_i32_6 : i32
    scf.if %9 {
      %c0_11 = arith.constant 0 : index
      %c0_12 = arith.constant 0 : index
      %16 = vector.load %arg9[%c0_11, %c0_12] : memref<16x128xf32, #tpu.memory_space<vmem>>, vector<16x128xf32>
      tpu.vector_store %arg9[%c0_11, %c0_12], %3 {strides = array<i32>} : memref<16x128xf32, #tpu.memory_space<vmem>>, vector<16x128xf32>,
      %c0_13 = arith.constant 0 : index
      %c0_14 = arith.constant 0 : index
      %17 = vector.load %arg10[%c0_13, %c0_14] : memref<16x128xf32, #tpu.memory_space<vmem>>, vector<16x128xf32>
      tpu.vector_store %arg10[%c0_13, %c0_14], %6 {strides = array<i32>} : memref<16x128xf32, #tpu.memory_space<vmem>>, vector<16x128xf32>,
    } else {
    }
    %c0_i32_7 = arith.constant 0 : i32
    %10 = arith.cmpi sgt, %arg2, %c0_i32_7 : i32
    %11 = arith.extui %10 : i1 to i32
    %c0_i32_8 = arith.constant 0 : i32
    %12 = arith.cmpi ne, %11, %c0_i32_8 : i32
    scf.if %12 {
      %c0_11 = arith.constant 0 : index
      %c0_12 = arith.constant 0 : index
      %16 = vector.load %arg9[%c0_11, %c0_12] : memref<16x128xf32, #tpu.memory_space<vmem>>, vector<16x128xf32>
      %17 = arith.addf %16, %3 : vector<16x128xf32>
      %c0_13 = arith.constant 0 : index
      %c0_14 = arith.constant 0 : index
      %18 = vector.load %arg9[%c0_13, %c0_14] : memref<16x128xf32, #tpu.memory_space<vmem>>, vector<16x128xf32>
      tpu.vector_store %arg9[%c0_13, %c0_14], %17 {strides = array<i32>} : memref<16x128xf32, #tpu.memory_space<vmem>>, vector<16x128xf32>,
      %c0_15 = arith.constant 0 : index
      %c0_16 = arith.constant 0 : index
      %19 = vector.load %arg10[%c0_15, %c0_16] : memref<16x128xf32, #tpu.memory_space<vmem>>, vector<16x128xf32>
      %20 = arith.addf %19, %6 : vector<16x128xf32>
      %c0_17 = arith.constant 0 : index
      %c0_18 = arith.constant 0 : index
      %21 = vector.load %arg10[%c0_17, %c0_18] : memref<16x128xf32, #tpu.memory_space<vmem>>, vector<16x128xf32>
      tpu.vector_store %arg10[%c0_17, %c0_18], %20 {strides = array<i32>} : memref<16x128xf32, #tpu.memory_space<vmem>>, vector<16x128xf32>,
    } else {
    }
    %c0_i32_9 = arith.constant 0 : i32
    %13 = arith.cmpi eq, %arg2, %c0_i32_9 : i32
    %14 = arith.extui %13 : i1 to i32
    %c0_i32_10 = arith.constant 0 : i32
    %15 = arith.cmpi ne, %14, %c0_i32_10 : i32
    scf.if %15 {
      %c0_11 = arith.constant 0 : index
      %c0_12 = arith.constant 0 : index
      %16 = vector.load %arg6[%c0_11, %c0_12] : memref<1x128xf32, #tpu.memory_space<vmem>>, vector<1x128xf32>
      %c0_13 = arith.constant 0 : index
      %c0_14 = arith.constant 0 : index
      %17 = vector.load %arg9[%c0_13, %c0_14] : memref<16x128xf32, #tpu.memory_space<vmem>>, vector<16x128xf32>
      %18 = vector.broadcast %16 : vector<1x128xf32> to vector<16x128xf32>
      %19 = arith.addf %17, %18 : vector<16x128xf32>
      %cst_15 = arith.constant 5.000000e-01 : f32
      %20 = vector.broadcast %cst_15 : f32 to vector<16x128xf32>
      %21 = arith.mulf %20, %19 : vector<16x128xf32>
      %cst_16 = arith.constant 0.707106769 : f32
      %22 = vector.broadcast %cst_16 : f32 to vector<16x128xf32>
      %23 = arith.mulf %19, %22 : vector<16x128xf32>
      %cst_17 = arith.constant 0.000000e+00 : f32
      %24 = vector.broadcast %cst_17 : f32 to vector<16x128xf32>
      %25 = arith.cmpf oge, %23, %24 : vector<16x128xf32>
      %cst_18 = arith.constant 1.000000e+00 : f32
      %cst_19 = arith.constant -1.000000e+00 : f32
      %26 = vector.broadcast %cst_18 : f32 to vector<16x128xf32>
      %27 = vector.broadcast %cst_19 : f32 to vector<16x128xf32>
      %28 = arith.select %25, %26, %27 : vector<16x128xi1>, vector<16x128xf32>
      %29 = math.absf %23 : vector<16x128xf32>
      %cst_20 = arith.constant 0.327591091 : f32
      %30 = vector.broadcast %cst_20 : f32 to vector<16x128xf32>
      %31 = arith.mulf %30, %29 : vector<16x128xf32>
      %cst_21 = arith.constant 1.000000e+00 : f32
      %32 = vector.broadcast %cst_21 : f32 to vector<16x128xf32>
      %33 = arith.addf %32, %31 : vector<16x128xf32>
      %cst_22 = arith.constant 1.000000e+00 : f32
      %34 = vector.broadcast %cst_22 : f32 to vector<16x128xf32>
      %35 = arith.divf %34, %33 : vector<16x128xf32>
      %cst_23 = arith.constant 1.06140542 : f32
      %36 = vector.broadcast %cst_23 : f32 to vector<16x128xf32>
      %37 = arith.mulf %36, %35 : vector<16x128xf32>
      %cst_24 = arith.constant -1.45315206 : f32
      %38 = vector.broadcast %cst_24 : f32 to vector<16x128xf32>
      %39 = arith.addf %37, %38 : vector<16x128xf32>
      %40 = arith.mulf %39, %35 : vector<16x128xf32>
      %cst_25 = arith.constant 1.42141378 : f32
      %41 = vector.broadcast %cst_25 : f32 to vector<16x128xf32>
      %42 = arith.addf %40, %41 : vector<16x128xf32>
      %43 = arith.mulf %42, %35 : vector<16x128xf32>
      %cst_26 = arith.constant -0.284496725 : f32
      %44 = vector.broadcast %cst_26 : f32 to vector<16x128xf32>
      %45 = arith.addf %43, %44 : vector<16x128xf32>
      %46 = arith.mulf %45, %35 : vector<16x128xf32>
      %cst_27 = arith.constant 0.254829586 : f32
      %47 = vector.broadcast %cst_27 : f32 to vector<16x128xf32>
      %48 = arith.addf %46, %47 : vector<16x128xf32>
      %49 = arith.mulf %48, %35 : vector<16x128xf32>
      %cst_28 = arith.constant 0.000000e+00 : f32
      %50 = vector.broadcast %cst_28 : f32 to vector<16x128xf32>
      %51 = arith.subf %50, %29 : vector<16x128xf32>
      %52 = arith.mulf %51, %29 : vector<16x128xf32>
      %53 = math.exp %52 : vector<16x128xf32>
      %54 = arith.mulf %49, %53 : vector<16x128xf32>
      %cst_29 = arith.constant 1.000000e+00 : f32
      %55 = vector.broadcast %cst_29 : f32 to vector<16x128xf32>
      %56 = arith.subf %55, %54 : vector<16x128xf32>
      %57 = arith.mulf %28, %56 : vector<16x128xf32>
      %cst_30 = arith.constant 1.000000e+00 : f32
      %58 = vector.broadcast %cst_30 : f32 to vector<16x128xf32>
      %59 = arith.addf %58, %57 : vector<16x128xf32>
      %60 = arith.mulf %21, %59 : vector<16x128xf32>
      %61 = arith.truncf %60 : vector<16x128xf32> to vector<16x128xbf16>
      %c0_31 = arith.constant 0 : index
      %c0_32 = arith.constant 0 : index
      %62 = vector.load %arg7[%c0_31, %c0_32] : memref<16x128xbf16, #tpu.memory_space<vmem>>, vector<16x128xbf16>
      tpu.vector_store %arg7[%c0_31, %c0_32], %61 {strides = array<i32>} : memref<16x128xbf16, #tpu.memory_space<vmem>>, vector<16x128xbf16>,
      %c0_33 = arith.constant 0 : index
      %c0_34 = arith.constant 0 : index
      %63 = vector.load %arg10[%c0_33, %c0_34] : memref<16x128xf32, #tpu.memory_space<vmem>>, vector<16x128xf32>
      %64 = vector.broadcast %16 : vector<1x128xf32> to vector<16x128xf32>
      %65 = arith.addf %63, %64 : vector<16x128xf32>
      %cst_35 = arith.constant 5.000000e-01 : f32
      %66 = vector.broadcast %cst_35 : f32 to vector<16x128xf32>
      %67 = arith.mulf %66, %65 : vector<16x128xf32>
      %cst_36 = arith.constant 0.707106769 : f32
      %68 = vector.broadcast %cst_36 : f32 to vector<16x128xf32>
      %69 = arith.mulf %65, %68 : vector<16x128xf32>
      %cst_37 = arith.constant 0.000000e+00 : f32
      %70 = vector.broadcast %cst_37 : f32 to vector<16x128xf32>
      %71 = arith.cmpf oge, %69, %70 : vector<16x128xf32>
      %cst_38 = arith.constant 1.000000e+00 : f32
      %cst_39 = arith.constant -1.000000e+00 : f32
      %72 = vector.broadcast %cst_38 : f32 to vector<16x128xf32>
      %73 = vector.broadcast %cst_39 : f32 to vector<16x128xf32>
      %74 = arith.select %71, %72, %73 : vector<16x128xi1>, vector<16x128xf32>
      %75 = math.absf %69 : vector<16x128xf32>
      %cst_40 = arith.constant 0.327591091 : f32
      %76 = vector.broadcast %cst_40 : f32 to vector<16x128xf32>
      %77 = arith.mulf %76, %75 : vector<16x128xf32>
      %cst_41 = arith.constant 1.000000e+00 : f32
      %78 = vector.broadcast %cst_41 : f32 to vector<16x128xf32>
      %79 = arith.addf %78, %77 : vector<16x128xf32>
      %cst_42 = arith.constant 1.000000e+00 : f32
      %80 = vector.broadcast %cst_42 : f32 to vector<16x128xf32>
      %81 = arith.divf %80, %79 : vector<16x128xf32>
      %cst_43 = arith.constant 1.06140542 : f32
      %82 = vector.broadcast %cst_43 : f32 to vector<16x128xf32>
      %83 = arith.mulf %82, %81 : vector<16x128xf32>
      %cst_44 = arith.constant -1.45315206 : f32
      %84 = vector.broadcast %cst_44 : f32 to vector<16x128xf32>
      %85 = arith.addf %83, %84 : vector<16x128xf32>
      %86 = arith.mulf %85, %81 : vector<16x128xf32>
      %cst_45 = arith.constant 1.42141378 : f32
      %87 = vector.broadcast %cst_45 : f32 to vector<16x128xf32>
      %88 = arith.addf %86, %87 : vector<16x128xf32>
      %89 = arith.mulf %88, %81 : vector<16x128xf32>
      %cst_46 = arith.constant -0.284496725 : f32
      %90 = vector.broadcast %cst_46 : f32 to vector<16x128xf32>
      %91 = arith.addf %89, %90 : vector<16x128xf32>
      %92 = arith.mulf %91, %81 : vector<16x128xf32>
      %cst_47 = arith.constant 0.254829586 : f32
      %93 = vector.broadcast %cst_47 : f32 to vector<16x128xf32>
      %94 = arith.addf %92, %93 : vector<16x128xf32>
      %95 = arith.mulf %94, %81 : vector<16x128xf32>
      %cst_48 = arith.constant 0.000000e+00 : f32
      %96 = vector.broadcast %cst_48 : f32 to vector<16x128xf32>
      %97 = arith.subf %96, %75 : vector<16x128xf32>
      %98 = arith.mulf %97, %75 : vector<16x128xf32>
      %99 = math.exp %98 : vector<16x128xf32>
      %100 = arith.mulf %95, %99 : vector<16x128xf32>
      %cst_49 = arith.constant 1.000000e+00 : f32
      %101 = vector.broadcast %cst_49 : f32 to vector<16x128xf32>
      %102 = arith.subf %101, %100 : vector<16x128xf32>
      %103 = arith.mulf %74, %102 : vector<16x128xf32>
      %cst_50 = arith.constant 1.000000e+00 : f32
      %104 = vector.broadcast %cst_50 : f32 to vector<16x128xf32>
      %105 = arith.addf %104, %103 : vector<16x128xf32>
      %106 = arith.mulf %67, %105 : vector<16x128xf32>
      %107 = arith.truncf %106 : vector<16x128xf32> to vector<16x128xbf16>
      %c0_51 = arith.constant 0 : index
      %c0_52 = arith.constant 0 : index
      %108 = vector.load %arg8[%c0_51, %c0_52] : memref<16x128xbf16, #tpu.memory_space<vmem>>, vector<16x128xbf16>
      tpu.vector_store %arg8[%c0_51, %c0_52], %107 {strides = array<i32>} : memref<16x128xbf16, #tpu.memory_space<vmem>>, vector<16x128xbf16>,
    } else {
    }
    return
  }
  func.func @transform_0(%arg0: i32, %arg1: i32, %arg2: i32) -> (i32, i32) {
    %c0_i32 = arith.constant 0 : i32
    return %arg0, %arg2 : i32, i32
  }
  func.func @transform_1(%arg0: i32, %arg1: i32, %arg2: i32) -> (i32, i32) {
    %c0_i32 = arith.constant 0 : i32
    return %arg0, %arg2 : i32, i32
  }
  func.func @transform_2(%arg0: i32, %arg1: i32, %arg2: i32) -> (i32, i32) {
    %c0_i32 = arith.constant 0 : i32
    return %arg2, %arg1 : i32, i32
  }
  func.func @transform_3(%arg0: i32, %arg1: i32, %arg2: i32) -> (i32, i32) {
    %c0_i32 = arith.constant 0 : i32
    %c0_i32_0 = arith.constant 0 : i32
    return %c0_i32, %arg1 : i32, i32
  }
  func.func @transform_4(%arg0: i32, %arg1: i32, %arg2: i32) -> (i32, i32) {
    %c0_i32 = arith.constant 0 : i32
    return %arg0, %arg1 : i32, i32
  }
  func.func @transform_5(%arg0: i32, %arg1: i32, %arg2: i32) -> (i32, i32) {
    %c0_i32 = arith.constant 0 : i32
    return %arg0, %arg1 : i32, i32
  }
}

</mosaic_0001>

<bundles_post_ra>
// kernel: ff_layer_forward.1
= control target key start
LH: loop header
LB: loop body
LE: loop exit
PB: predicated region body
PF: predicated region fallthrough
CT: control target
= control target key end

     0   :  { %s539_s2 = inlined_call_operand.vmem [shape: bf16[128,128], index: 2, kind: input, shape index: {}]   ;;  %s540_s3 = inlined_call_operand.vmem [shape: f32[1,128], index: 3, kind: input, shape index: {}]   ;;  %s541_s0 = inlined_call_operand.vmem [shape: f32[16,128], index: 0, kind: input, shape index: {}]   ;;  %s542_s1 = inlined_call_operand.vmem [shape: f32[16,128], index: 1, kind: input, shape index: {}]   ;;  %s543_s4 = inlined_call_operand.vmem [shape: bf16[16,128], index: 4, kind: output, shape index: {0}]   ;;  %s544_s5 = inlined_call_operand.vmem [shape: bf16[16,128], index: 5, kind: output, shape index: {1}]  }
   0x1   :  { %v371_v0 = vld [vmem:[%s539_s2 + $0x38] sm:$0xff]  ;;  %v370_v1 = vld [vmem:[%s539_s2 + $0x30] sm:$0xff]  ;;  %v369_v2 = vld [vmem:[%s539_s2 + $0x28] sm:$0xff] }
   0x2   :  { %86 = vmatpush.bf16.msra.mxu0 %v371_v0  ;;  %103 = vmatpush.bf16.msra.mxu1 %v371_v0  ;;  %v368_v3 = vld [vmem:[%s539_s2 + $0x20] sm:$0xff]  ;;  %v367_v4 = vld [vmem:[%s539_s2 + $0x18] sm:$0xff]  ;;  %v366_v5 = vld [vmem:[%s539_s2 + $0x10] sm:$0xff] }
   0x3   :  { %v365_v6 = vld [vmem:[%s539_s2 + $0x8] sm:$0xff]  ;;  %v364_v7 = vld [vmem:[%s539_s2] sm:$0xff] }
   0x4   :  { %v35_v8 = vld [vmem:[%s541_s0] sm:$0xff]  ;;  %v36_v9 = vld [vmem:[%s541_s0 + $0x8] sm:$0xff] }
   0x5   :  { %v100_v10 = vld [vmem:[%s542_s1] sm:$0xff]  ;;  %v101_v11 = vld [vmem:[%s542_s1 + $0x8] sm:$0xff]  ;;  %v37_v12 = vpack.c.bf16 %v36_v9, %v35_v8 }
   0x6   :  { %87 = vmatpush.bf16.msra.mxu0 %v370_v1  ;;  %104 = vmatpush.bf16.msra.mxu1 %v370_v1  ;;  %v102_v13 = vpack.c.bf16 %v101_v11, %v100_v10  ;;  %v383_v14 = vld [vmem:[%s540_s3] ss:$0 sm:$0xff] }
   0xa   :  { %88 = vmatpush.bf16.msra.mxu0 %v369_v2  ;;  %105 = vmatpush.bf16.msra.mxu1 %v369_v2 }
   0xe   :  { %89 = vmatpush.bf16.msra.mxu0 %v368_v3  ;;  %106 = vmatpush.bf16.msra.mxu1 %v368_v3 }
  0x12   :  { %90 = vmatpush.bf16.msra.mxu0 %v367_v4  ;;  %107 = vmatpush.bf16.msra.mxu1 %v367_v4 }
  0x16   :  { %91 = vmatpush.bf16.msra.mxu0 %v366_v5  ;;  %108 = vmatpush.bf16.msra.mxu1 %v366_v5 }
  0x1a   :  { %92 = vmatpush.bf16.msra.mxu0 %v365_v6  ;;  %109 = vmatpush.bf16.msra.mxu1 %v365_v6 }
  0x1e   :  { %93 = vmatpush.bf16.msra.mxu0 %v364_v7  ;;  %110 = vmatpush.bf16.msra.mxu1 %v364_v7 }
  0x21   :  { %94 = vmatmul.bf16.vlgmr.msra.gmra.mxu0 %v37_v12  ;;  %111 = vmatmul.bf16.vlgmr.msra.gmra.mxu1 %v102_v13 }
  0x9e   :  { %v95_v15 = vpop.f32.mrf.mxu0  ;;  %v112_v16 = vpop.f32.mrf.mxu1 }
  0x9f   :  { %v470_v17 = vadd.f32 %v383_v14, %v95_v15  ;;  %v472_v18 = vadd.f32 %v383_v14, %v112_v16 }
  0xa1   :  { %v475_v19 = vmul.f32 0.70710677, %v470_v17  ;;  %v478_v20 = vmul.f32 0.70710677, %v472_v18 }
  0xa3   :  { %v160_v21 = vand.u32 2147483647, %v475_v19  ;;  %v248_v22 = vand.u32 2147483647, %v478_v20 }
  0xa5   :  { %v162_v23 = vmul.f32 0.3275911, %v160_v21  ;;  %v250_v24 = vmul.f32 0.3275911, %v248_v22  ;;  %v214_v42 = vsub.f32 0.0, %v160_v21  ;;  %v302_v43 = vsub.f32 0.0, %v248_v22 }
  0xa6   :  { %v97_v25 = vpop.f32.mrf.mxu0  ;;  %v114_v26 = vpop.f32.mrf.mxu1 }
  0xa7   :  { %v164_v27 = vadd.f32 1.0, %v162_v23  ;;  %v252_v28 = vadd.f32 1.0, %v250_v24  ;;  %v482_v29 = vadd.f32 %v383_v14, %v97_v25  ;;  %v484_v30 = vadd.f32 %v383_v14, %v114_v26 }
  0xa8   :  { %v216_v57 = vmul.f32 %v214_v42, %v160_v21  ;;  %v304_v61 = vmul.f32 %v302_v43, %v248_v22 }
  0xa9   :  { %384 = vrcp.f32 %v164_v27  ;;  %v487_v31 = vmul.f32 0.70710677, %v482_v29  ;;  %v490_v32 = vmul.f32 0.70710677, %v484_v30  ;;  %v175_v45 = vand.u32 2147483647, %v164_v27 }
  0xaa   :  { %386 = vrcp.f32 %v252_v28  ;;  %v177_v46 = vand.u32 2147483648, %v164_v27  ;;  %v265_v50 = vand.u32 2147483648, %v252_v28  ;;  %v263_v52 = vand.u32 2147483647, %v252_v28 }
  0xab   :  { %v493_v33 = vand.u32 2147483647, %v487_v31  ;;  %v496_v35 = vand.u32 2147483647, %v490_v32  ;;  %vm171_vm2 = vweird.f32 %v164_v27  ;;  %vm259_vm4 = vweird.f32 %v252_v28 }
  0xac   :  { %v178_v54 = vor.u32 1.1754944e-38, %v177_v46  ;;  %vm176_vm5 = vcmp.eq.f32.partialorder %v175_v45, 8.507059e+37  ;;  %v266_v58 = vor.u32 1.1754944e-38, %v265_v50  ;;  %vm264_vm7 = vcmp.eq.f32.partialorder %v263_v52, 8.507059e+37 }
  0xad   :  { %v163_v38 = vmul.f32 0.3275911, %v493_v33  ;;  %v251_v40 = vmul.f32 0.3275911, %v496_v35  ;;  %v218_v5 = vmul.f32 1.442695, %v216_v57 }
  0xae   :  { %v306_v8 = vmul.f32 1.442695, %v304_v61  ;;  %v215_v26 = vsub.f32 0.0, %v493_v33  ;;  %v303_v45 = vsub.f32 0.0, %v496_v35 }
  0xaf   :  { %v385_v34 = vpop.eup %384  ;;  %v500_v44 = vadd.f32 1.0, %v163_v38  ;;  %v502_v48 = vadd.f32 1.0, %v251_v40 }
  0xb0   :  { %v387_v36 = vpop.eup %386  ;;  %v167_v37 = vmul.f32 %v385_v34, %v164_v27  ;;  %vm172_vm0 = vweird.f32 %v385_v34 }
  0xb1   :  { %v255_v39 = vmul.f32 %v387_v36, %v252_v28  ;;  %388 = vrcp.f32 %v500_v44  ;;  %vm260_vm1 = vweird.f32 %v387_v36  ;;  %vm173_vm3 = vmor %vm171_vm2, %vm172_vm0  ;;  %v190_v11 = vand.u32 2147483647, %v500_v44 }
  0xb2   :  { %v168_v41 = vsub.f32 1.0, %v167_v37  ;;  %390 = vrcp.f32 %v502_v48  ;;  %vm261_vm6 = vmor %vm259_vm4, %vm260_vm1  ;;  %v192_v12 = vand.u32 2147483648, %v500_v44  ;;  %v280_v16 = vand.u32 2147483648, %v502_v48 }
  0xb3   :  { %v256_v47 = vsub.f32 1.0, %v255_v39  ;;  %v278_v23 = vand.u32 2147483647, %v502_v48  ;;  %vm186_vm10 = vweird.f32 %v500_v44  ;;  %vm274_vm12 = vweird.f32 %v502_v48 }
  0xb4   :  { %v169_v49 = vmul.f32 %v385_v34, %v168_v41  ;;  %v193_v28 = vor.u32 1.1754944e-38, %v192_v12  ;;  %vm191_vm13 = vcmp.eq.f32.partialorder %v190_v11, 8.507059e+37  ;;  %v281_v38 = vor.u32 1.1754944e-38, %v280_v16 }
  0xb5   :  { %v257_v51 = vmul.f32 %v387_v36, %v256_v47  ;;  %vm279_vm15 = vcmp.eq.f32.partialorder %v278_v23, 8.507059e+37  ;;  %392 = vpow2.f32 %v218_v5  ;;  %vm156_vm0 = vcmp.ge.f32.partialorder %v475_v19, 0.0 }
  0xb6   :  { %v170_v53 = vadd.f32 %v385_v34, %v169_v49  ;;  %394 = vpow2.f32 %v306_v8  ;;  %vm244_vm1 = vcmp.ge.f32.partialorder %v478_v20, 0.0  ;;  %vm157_vm2 = vcmp.ge.f32.partialorder %v487_v31, 0.0 }
  0xb7   :  { %v258_v55 = vadd.f32 %v387_v36, %v257_v51  ;;  %v389_v62 = vpop.eup %388  ;;  %v217_v51 = vmul.f32 %v215_v26, %v493_v33  ;;  %v240_v31 = vmul.f32 0.5, %v472_v18 }
  0xb8   :  { %v174_v56 = vsel %vm173_vm3, %v385_v34, %v170_v53  ;;  %v391_v1 = vpop.eup %390  ;;  %v182_v3 = vmul.f32 %v389_v62, %v500_v44  ;;  %vm187_vm8 = vweird.f32 %v389_v62  ;;  %vm245_vm3 = vcmp.ge.f32.partialorder %v490_v32, 0.0 }
  0xb9   :  { %v506_v59 = vsel %vm176_vm5, %v178_v54, %v174_v56  ;;  %v262_v60 = vsel %vm261_vm6, %v387_v36, %v258_v55  ;;  %v270_v6 = vmul.f32 %v391_v1, %v502_v48  ;;  %vm275_vm9 = vweird.f32 %v391_v1  ;;  %vm188_vm11 = vmor %vm186_vm10, %vm187_vm8 }
  0xba   :  { %v196_v63 = vmul.f32 1.0614054, %v506_v59  ;;  %v267_v0 = vsel %vm264_vm7, %v266_v58, %v262_v60  ;;  %v183_v9 = vsub.f32 1.0, %v182_v3  ;;  %vm276_vm14 = vmor %vm274_vm12, %vm275_vm9  ;;  %v305_v55 = vmul.f32 %v303_v45, %v496_v35 }
  0xbb   :  { %v284_v2 = vmul.f32 1.0614054, %v267_v0  ;;  %v271_v13 = vsub.f32 1.0, %v270_v6  ;;  %v220_v61 = vmul.f32 1.442695, %v217_v51 }
  0xbc   :  { %v198_v4 = vadd.f32 -1.4531521, %v196_v63  ;;  %v184_v15 = vmul.f32 %v389_v62, %v183_v9 }
  0xbd   :  { %v286_v7 = vadd.f32 -1.4531521, %v284_v2  ;;  %v272_v22 = vmul.f32 %v391_v1, %v271_v13  ;;  %v393_v2 = vpop.eup %392  ;;  %396 = vpow2.f32 %v220_v61  ;;  %v400_v13 = vmov -1.0  }
  0xbe   :  { %v200_v10 = vmul.f32 %v198_v4, %v506_v59  ;;  %v185_v25 = vadd.f32 %v389_v62, %v184_v15  ;;  %v395_v4 = vpop.eup %394  ;;  %v159_v26 = vsel %vm157_vm2, 1.0, %v400_v13 }
  0xbf   :  { %v288_v14 = vmul.f32 %v286_v7, %v267_v0  ;;  %v273_v34 = vadd.f32 %v391_v1, %v272_v22  ;;  %v246_v22 = vsel %vm244_vm1, 1.0, %v400_v13 }
  0xc0   :  { %v202_v21 = vadd.f32 1.4214138, %v200_v10  ;;  %v189_v37 = vsel %vm188_vm11, %v389_v62, %v185_v25 }
  0xc1   :  { %v290_v24 = vadd.f32 1.4214138, %v288_v14  ;;  %v194_v40 = vsel %vm191_vm13, %v193_v28, %v189_v37  ;;  %v277_v41 = vsel %vm276_vm14, %v391_v1, %v273_v34  ;;  %v308_v1 = vmul.f32 1.442695, %v305_v55 }
  0xc2   :  { %v204_v27 = vmul.f32 %v202_v21, %v506_v59  ;;  %v197_v43 = vmul.f32 1.0614054, %v194_v40  ;;  %v282_v44 = vsel %vm279_vm15, %v281_v38, %v277_v41  ;;  %v158_v14 = vsel %vm156_vm0, 1.0, %v400_v13 }
  0xc3   :  { %v292_v36 = vmul.f32 %v290_v24, %v267_v0  ;;  %v285_v47 = vmul.f32 1.0614054, %v282_v44  ;;  %398 = vpow2.f32 %v308_v1  ;;  %v397_v12 = vpop.eup %396  ;;  %v247_v34 = vsel %vm245_vm3, 1.0, %v400_v13 }
  0xc4   :  { %v206_v39 = vadd.f32 -0.28449672, %v204_v27  ;;  %v199_v50 = vadd.f32 -1.4531521, %v197_v43  ;;  %v152_v38 = vmul.f32 0.5, %v470_v17  ;;  %v241_v41 = vmul.f32 0.5, %v484_v30 }
  0xc5   :  { %v294_v42 = vadd.f32 -0.28449672, %v292_v36  ;;  %v287_v52 = vadd.f32 -1.4531521, %v285_v47 }
  0xc6   :  { %v208_v46 = vmul.f32 %v206_v39, %v506_v59  ;;  %v201_v54 = vmul.f32 %v199_v50, %v194_v40  ;;  %v153_v39 = vmul.f32 0.5, %v482_v29 }
  0xc7   :  { %v296_v49 = vmul.f32 %v294_v42, %v267_v0  ;;  %v289_v56 = vmul.f32 %v287_v52, %v282_v44 }
  0xc8   :  { %v210_v48 = vadd.f32 0.2548296, %v208_v46  ;;  %v203_v58 = vadd.f32 1.4214138, %v201_v54 }
  0xc9   :  { %v298_v53 = vadd.f32 0.2548296, %v296_v49  ;;  %v291_v62 = vadd.f32 1.4214138, %v289_v56  ;;  %v399_v16 = vpop.eup %398 }
  0xca   :  { %v212_v57 = vmul.f32 %v210_v48, %v506_v59  ;;  %v205_v63 = vmul.f32 %v203_v58, %v194_v40 }
  0xcb   :  { %v300_v60 = vmul.f32 %v298_v53, %v267_v0  ;;  %v293_v3 = vmul.f32 %v291_v62, %v282_v44 }
  0xcc   :  { %v222_v5 = vmul.f32 %v393_v2, %v212_v57  ;;  %v207_v33 = vadd.f32 -0.28449672, %v205_v63 }
  0xcd   :  { %v310_v6 = vmul.f32 %v395_v4, %v300_v60  ;;  %v295_v7 = vadd.f32 -0.28449672, %v293_v3 }
  0xce   :  { %v209_v8 = vmul.f32 %v207_v33, %v194_v40  ;;  %v224_v59 = vsub.f32 1.0, %v222_v5 }
  0xcf   :  { %v297_v35 = vmul.f32 %v295_v7, %v282_v44  ;;  %v312_v0 = vsub.f32 1.0, %v310_v6 }
  0xd0   :  { %v211_v9 = vadd.f32 0.2548296, %v209_v8  ;;  %v226_v21 = vmul.f32 %v224_v59, %v158_v14 }
  0xd1   :  { %v299_v10 = vadd.f32 0.2548296, %v297_v35  ;;  %v314_v24 = vmul.f32 %v312_v0, %v246_v22 }
  0xd2   :  { %v213_v11 = vmul.f32 %v211_v9, %v194_v40  ;;  %v228_v27 = vadd.f32 1.0, %v226_v21 }
  0xd3   :  { %v301_v15 = vmul.f32 %v299_v10, %v282_v44  ;;  %v316_v36 = vadd.f32 1.0, %v314_v24 }
  0xd4   :  { %v223_v23 = vmul.f32 %v397_v12, %v213_v11  ;;  %v230_v32 = vmul.f32 %v228_v27, %v152_v38 }
  0xd5   :  { %v311_v19 = vmul.f32 %v399_v16, %v301_v15  ;;  %v318_v44 = vmul.f32 %v316_v36, %v240_v31 }
  0xd6   :  { %v225_v25 = vsub.f32 1.0, %v223_v23 }
  0xd7   :  { %v313_v20 = vsub.f32 1.0, %v311_v19 }
  0xd8   :  { %v227_v28 = vmul.f32 %v225_v25, %v159_v26 }
  0xd9   :  { %v315_v37 = vmul.f32 %v313_v20, %v247_v34 }
  0xda   :  { %v229_v40 = vadd.f32 1.0, %v227_v28 }
  0xdb   :  { %v317_v42 = vadd.f32 1.0, %v315_v37 }
  0xdc   :  { %v231_v43 = vmul.f32 %v229_v40, %v153_v39 }
  0xdd   :  { %v319_v45 = vmul.f32 %v317_v42, %v241_v41 }
  0xde   :  { %v375_v46 = vpack.c.bf16 %v231_v43, %v230_v32 }
  0xdf   :  { %v380_v47 = vpack.c.bf16 %v319_v45, %v318_v44 }
  0xe0   :  { %376 = vst [vmem:[%s543_s4] sm:$0xff] %v375_v46  }
  0xe1   :  { %381 = vst [vmem:[%s544_s5] sm:$0xff] %v380_v47  }

</bundles_post_ra>
